<compile_context>
chip_gen: v7x
topology: tpu7x:2x2x1
jax: 0.10.0
libtpu: 0.0.40
codegen_flags: <defaults>
</compile_context>

<pallas_src>
import functools

import jax
import jax.numpy as jnp
from jax.experimental import pallas as pl
from jax.experimental.pallas import tpu as pltpu


_POINTS_PER_LANE_ROW = 128          # points packed into one lane-dense row
_N_BUCKET = 8192                    # row-count bucket (multiple of 128) -> bounded recompiles
_TARGET_BLOCK_BYTES = 1280 * 1024   # ~1.25 MiB per pipelined block buffer
_MIN_PALLAS_ROWS = 32768            # below this, fused XLA beats kernel-launch overhead


def _shift_flat_kernel(pts_ref, off_ref, out_ref):
    # pts_ref: (tile_r, 128*C) lane-dense tile of flattened points.
    # off_ref: (1, 128*C) tiled [x0, y0, z0, 0, ..., 0] offsets (VMEM-resident,
    #          constant index_map). No in-kernel array constants -> no capture.
    out_ref[...] = pts_ref[...] - off_ref[...]


@functools.partial(jax.jit, static_argnames=("pc_min",))
def _shift_points_padded(points_pad, pc_min):
    """points_pad: [N_pad, C], N_pad a multiple of 128. Returns shifted [N_pad, C]."""
    n_pad, c = points_pad.shape
    dtype = points_pad.dtype
    itemsize = dtype.itemsize
    lane_w = _POINTS_PER_LANE_ROW * c
    r = n_pad // _POINTS_PER_LANE_ROW

    # Lane-dense flat view: each row holds 128 consecutive points (row-major),
    # so the last dim is a multiple of 128 -> unmasked vld/vst, no lane padding.
    flat = points_pad.reshape(r, lane_w)

    # Per-point offset pattern [x0, y0, z0, 0, ...] tiled across 128 points,
    # passed as an operand (NOT built inside the kernel).
    off_row = jnp.tile(
        jnp.asarray(list(pc_min) + [0.0] * (c - 3), dtype=dtype),
        _POINTS_PER_LANE_ROW,
    ).reshape(1, lane_w)

    # Row-tile sized to ~1.25 MiB per block buffer (512 rows at C=5 f32);
    # double-buffered in+out ~= 5 MiB -> fits every generation's scoped VMEM.
    tile_r = _TARGET_BLOCK_BYTES // (lane_w * itemsize)
    tile_r = max(8, (tile_r // 8) * 8)
    tile_r = min(tile_r, r)

    shifted_flat = pl.pallas_call(
        _shift_flat_kernel,
        out_shape=jax.ShapeDtypeStruct((r, lane_w), dtype),
        grid=(pl.cdiv(r, tile_r),),
        in_specs=[
            pl.BlockSpec((tile_r, lane_w), lambda i: (i, 0)),
            pl.BlockSpec((1, lane_w), lambda i: (0, 0)),  # resident offsets
        ],
        out_specs=pl.BlockSpec((tile_r, lane_w), lambda i: (i, 0)),
        compiler_params=pltpu.CompilerParams(
            dimension_semantics=("parallel",),
        ),
        cost_estimate=pl.CostEstimate(
            flops=n_pad * c,
            transcendentals=0,
            bytes_accessed=2 * n_pad * c * itemsize + lane_w * itemsize,
        ),
    )(flat, off_row)
    return shifted_flat.reshape(n_pad, c)


class IdentityReader:
    """JAX/Pallas port of the det3d Identity reader."""

    def __init__(self, pc_range, name="Identity",
                 min_pallas_rows=_MIN_PALLAS_ROWS, **kwargs):
        self.name = name
        self.pc_range = pc_range
        self.min_pallas_rows = int(min_pallas_rows)
        # Only the min corner is needed; kept as hashable floats (static jit arg).
        self._pc_min = (float(pc_range[0]), float(pc_range[1]), float(pc_range[2]))
        self._last_path = None  # "pallas" / "xla", for tests / introspection

    def _fast_path(self, points):
        # Plain fused XLA path for tiny / degenerate inputs.
        c = points.shape[1]
        k = min(3, c)
        if k:
            off = jnp.asarray(self._pc_min[:k], dtype=points.dtype)
            xyz = points[:, :k] - off
        else:
            xyz = points[:, :0]
        feats = points[:, 3:]
        return xyz, feats

    def __call__(self, example, **kwargs):
        points_list = [jnp.asarray(p) for p in example.pop("points")]
        if not points_list:
            raise ValueError("IdentityReader: empty points list")
        dtypes = {p.dtype for p in points_list}
        if len(dtypes) != 1:
            raise ValueError(f"point clouds must share a dtype, got {dtypes}")
        chans = {p.shape[1] for p in points_list}
        if len(chans) != 1:
            raise ValueError(f"point clouds must share channel count, got {chans}")
        c = chans.pop()
        dtype = dtypes.pop()

        xyz_batch_cnt = [int(p.shape[0]) for p in points_list]
        n = sum(xyz_batch_cnt)

        use_pallas = (c >= 3) and (n >= self.min_pallas_rows) and (n > 0)
        if not use_pallas:
            self._last_path = "xla"
            points = (points_list[0] if len(points_list) == 1
                      else jnp.concatenate(points_list, axis=0))
            xyz, feats = self._fast_path(points)
        else:
            self._last_path = "pallas"
            # Bucket N (multiple of 8192 rows) so Mosaic compiles are cached;
            # concat + zero-pad happen in one pass.
            n_pad = -(-n // _N_BUCKET) * _N_BUCKET
            parts = list(points_list)
            if n_pad > n:
                parts.append(jnp.zeros((n_pad - n, c), dtype=dtype))
            points_pad = parts[0] if len(parts) == 1 else jnp.concatenate(parts, axis=0)

            shifted = _shift_points_padded(points_pad, self._pc_min)
            # Cheap follow-up slices (lane-dense kernel, narrow split left to XLA).
            xyz = shifted[:n, :3]
            feats = shifted[:n, 3:]

        example["xyz"] = xyz
        example["pt_features"] = feats
        example["xyz_batch_cnt"] = jnp.asarray(xyz_batch_cnt, dtype=jnp.int32)
        return example


if __name__ == "__main__":
    key = jax.random.PRNGKey(0)
    k0, k1 = jax.random.split(key)

    # Two small point clouds, C = 5 (x, y, z, intensity, t).
    pc_range = [-50.0, -50.0, -5.0, 50.0, 50.0, 3.0]
    pts0 = jax.random.uniform(k0, (300, 5), dtype=jnp.float32, minval=-40.0, maxval=40.0)
    pts1 = jax.random.uniform(k1, (212, 5), dtype=jnp.float32, minval=-40.0, maxval=40.0)

    def ref(points_list):
        off = jnp.asarray(pc_range[:3], jnp.float32)
        xyz, feats, cnt = [], [], []
        for p in points_list:
            xyz.append(p[:, :3] - off)
            feats.append(p[:, 3:])
            cnt.append(p.shape[0])
        return (jnp.concatenate(xyz, 0), jnp.concatenate(feats, 0),
                jnp.asarray(cnt, jnp.int32))

    rx, rf, rc = ref([pts0, pts1])

    # 1) Pallas path (forced for the small demo via min_pallas_rows=1).
    reader = IdentityReader(pc_range, min_pallas_rows=1)
    out = reader({"points": [pts0, pts1], "metadata": "dummy"})
    jax.block_until_ready(out["xyz"])
    jax.block_until_ready(out["pt_features"])
    jax.block_until_ready(out["xyz_batch_cnt"])
    assert reader._last_path == "pallas"
    assert out["xyz"].shape == (512, 3), out["xyz"].shape
    assert out["pt_features"].shape == (512, 2), out["pt_features"].shape
    assert out["xyz_batch_cnt"].dtype == jnp.int32
    assert jnp.allclose(out["xyz"], rx, atol=1e-6)
    assert jnp.allclose(out["pt_features"], rf, atol=1e-6)
    assert jnp.array_equal(out["xyz_batch_cnt"], rc)

    # 2) Default configuration exercises the small-N XLA fast path.
    reader_fast = IdentityReader(pc_range)
    out2 = reader_fast({"points": [pts0, pts1]})
    jax.block_until_ready(out2["xyz"])
    assert reader_fast._last_path == "xla"
    assert jnp.allclose(out2["xyz"], rx, atol=1e-6)
    assert jnp.allclose(out2["pt_features"], rf, atol=1e-6)
    assert jnp.array_equal(out2["xyz_batch_cnt"], rc)

    print("KERNEL_OK")
</pallas_src>

<mosaic_0001>
module attributes {stable_mosaic.version = 11 : i64} {
  func.func @_shift_flat_kernel(%arg0: i32, %arg1: memref<64x640xf32, #tpu.memory_space<vmem>>, %arg2: memref<1x640xf32, #tpu.memory_space<vmem>>, %arg3: memref<64x640xf32, #tpu.memory_space<vmem>>) attributes {dimension_semantics = [#tpu.dimension_semantics<parallel>], iteration_bounds = array<i64: 1>, scalar_prefetch = 0 : i64, scratch_operands = 0 : i64, tpu.core_type = #tpu.core_type<tc>, window_params = [{transform_indices = @transform_0, window_bounds = array<i64: 64, 640>}, {pipeline_mode = #tpu.pipeline_mode<synchronous>, transform_indices = @transform_1, window_bounds = array<i64: 1, 640>}, {transform_indices = @transform_2, window_bounds = array<i64: 64, 640>}]} {
    %c0 = arith.constant 0 : index
    %c0_0 = arith.constant 0 : index
    %0 = vector.load %arg1[%c0, %c0_0] : memref<64x640xf32, #tpu.memory_space<vmem>>, vector<64x640xf32>
    %c0_1 = arith.constant 0 : index
    %c0_2 = arith.constant 0 : index
    %1 = vector.load %arg2[%c0_1, %c0_2] : memref<1x640xf32, #tpu.memory_space<vmem>>, vector<1x640xf32>
    %2 = vector.broadcast %1 : vector<1x640xf32> to vector<64x640xf32>
    %3 = arith.subf %0, %2 : vector<64x640xf32>
    %c0_3 = arith.constant 0 : index
    %c0_4 = arith.constant 0 : index
    %4 = vector.load %arg3[%c0_3, %c0_4] : memref<64x640xf32, #tpu.memory_space<vmem>>, vector<64x640xf32>
    tpu.vector_store %arg3[%c0_3, %c0_4], %3 {strides = array<i32>} : memref<64x640xf32, #tpu.memory_space<vmem>>, vector<64x640xf32>,
    return
  }
  func.func @transform_0(%arg0: i32) -> (i32, i32) {
    %c0_i32 = arith.constant 0 : i32
    %c0_i32_0 = arith.constant 0 : i32
    return %arg0, %c0_i32 : i32, i32
  }
  func.func @transform_1(%arg0: i32) -> (i32, i32) {
    %c0_i32 = arith.constant 0 : i32
    %c0_i32_0 = arith.constant 0 : i32
    %c0_i32_1 = arith.constant 0 : i32
    return %c0_i32, %c0_i32_0 : i32, i32
  }
  func.func @transform_2(%arg0: i32) -> (i32, i32) {
    %c0_i32 = arith.constant 0 : i32
    %c0_i32_0 = arith.constant 0 : i32
    return %arg0, %c0_i32 : i32, i32
  }
}

</mosaic_0001>

<bundles_post_ra>
// kernel: tile.6
= control target key start
LH: loop header
LB: loop body
LE: loop exit
PB: predicated region body
PF: predicated region fallthrough
CT: control target
= control target key end

     0   :  { %2 = vsyncpa [#allocation1], 0  ;;  %s89_s6 = smov [#allocation0]   ;;  %s160_s0 = inlined_call_operand.hbm [shape: f32[5], index: 0, kind: input, shape index: {}]   ;;  %s161_s1 = inlined_call_operand.vmem [shape: f32[128,5], index: 1, kind: output, shape index: {}]  }
   0x1   :  { %s9_s7 = sshll.u32 %s89_s6, 4  ;;  %s65_s10 = scalar_lea.hbm %s160_s0, 16  ;;  %s10_s7 = int_to_ptr.vmem [resolvable:$true] %s9_s7 }
   0x2   :  { %p66_p0 = scmp.ne.s32.totalorder %s160_s0, %s65_s10  ;;  %p69_p1 = scmp.lt.u32.totalorder %s65_s10, %s160_s0 }
   0x4   :  { %p71_p2 = pnand %p69_p1, %p66_p0 }
   0x6   :  { %74 = shalt.err (!%p71_p2)
}
   0x7   :  { %s75_s15 = scalar_lea.vmem %s10_s7, 16  ;;  %s79_s16 = scalar_lea.vmem %s10_s7, 32 }
   0x8   :  { %p76_p3 = scmp.ne.s32.totalorder %s10_s7, %s75_s15  ;;  %p80_p4 = scmp.lt.s32.totalorder %s10_s7, %s10_s7 }
   0x9   :  { %p81_p5 = scmp.lt.s32.totalorder %s79_s16, %s75_s15 }
   0xb   :  { %p82_p6 = por %p81_p5, %p80_p4 }
   0xd   :  { %p83_p7 = pnand %p82_p6, %p76_p3 }
   0xf   :  { %86 = shalt.err (!%p83_p7)
}
  0x10   :  { %12 = dma.hbm_to_vmem [thread:$0]  %s160_s0, 16, %s10_s7, [#allocation1]  }
  0x11   :  { %87 = dma.done.wait [#allocation1], 16  }
  0x12   :  { %88 = vsyncadd [#allocation1], 4294967280  ;;  %v16_v0 = vld [vmem:[#allocation0] ss:$0 sm:$0xff] }
  0x13   :  { %17 = vst [vmem:[%s161_s1] sm:$0xff] %v16_v0  ;;  %49 = vst [vmem:[%s161_s1 + $0x8] sm:$0xff] %v16_v0 }
  0x14   :  { %50 = vst [vmem:[%s161_s1 + $0x10] sm:$0xff] %v16_v0  ;;  %51 = vst [vmem:[%s161_s1 + $0x18] sm:$0xff] %v16_v0 }
  0x15   :  { %52 = vst [vmem:[%s161_s1 + $0x20] sm:$0xff] %v16_v0  ;;  %53 = vst [vmem:[%s161_s1 + $0x28] sm:$0xff] %v16_v0 }
  0x16   :  { %54 = vst [vmem:[%s161_s1 + $0x30] sm:$0xff] %v16_v0  ;;  %55 = vst [vmem:[%s161_s1 + $0x38] sm:$0xff] %v16_v0 }
  0x17   :  { %56 = vst [vmem:[%s161_s1 + $0x40] sm:$0xff] %v16_v0  ;;  %57 = vst [vmem:[%s161_s1 + $0x48] sm:$0xff] %v16_v0 }
  0x18   :  { %58 = vst [vmem:[%s161_s1 + $0x50] sm:$0xff] %v16_v0  ;;  %59 = vst [vmem:[%s161_s1 + $0x58] sm:$0xff] %v16_v0 }
  0x19   :  { %60 = vst [vmem:[%s161_s1 + $0x60] sm:$0xff] %v16_v0  ;;  %61 = vst [vmem:[%s161_s1 + $0x68] sm:$0xff] %v16_v0 }
  0x1a   :  { %62 = vst [vmem:[%s161_s1 + $0x70] sm:$0xff] %v16_v0  ;;  %63 = vst [vmem:[%s161_s1 + $0x78] sm:$0xff] %v16_v0 }
  0x1b   :  { %48 = vsyncpa [#allocation1], 1 }

// kernel: tile.7
= control target key start
LH: loop header
LB: loop body
LE: loop exit
PB: predicated region body
PF: predicated region fallthrough
CT: control target
= control target key end

     0   :  { %vm9_vm0 = vcmask 7168   ;;  %vm27_vm1 = vcmask 23552   ;;  %s1191_s14 = smov 127   ;;  %vm23_vm2 = vcmask 15360   ;;  %s1192_s19 = smov 125   ;;  %vm13_vm3 = vcmask 31744   ;;  %s1747_s0 = inlined_call_operand.vmem [shape: f32[128,5], index: 0, kind: input, shape index: {}]   ;;  %s1748_s1 = inlined_call_operand.vmem [shape: f32[1,640], index: 1, kind: output, shape index: {}]  }
   0x1   :  { %v929_v0 = vld [vmem:[%s1747_s0 + $0x33] sm:$0x1]   ;;  %v933_v3 = vld [vmem:[%s1747_s0 + $0x19] sm:$0x1]   ;;  %v931_v6 = vld [vmem:[%s1747_s0 + $0x66] sm:$0x1]  }
   0x2   :  { %v930_v1 = vld [vmem:[%s1747_s0 + $0x33] sm:$0x1]   ;;  %v934_v4 = vld [vmem:[%s1747_s0 + $0x19] sm:$0x1]   ;;  %v932_v7 = vld [vmem:[%s1747_s0 + $0x66] sm:$0x1]  }
   0x3   :  { %v10_v2 = vsel %vm9_vm0, %v930_v1, %v929_v0  ;;  %v38_v5 = vsel %vm27_vm1, %v934_v4, %v933_v3  ;;  %v24_v8 = vsel %vm23_vm2, %v932_v7, %v931_v6  ;;  %v935_v9 = vld [vmem:[%s1747_s0 + $0x4c] sm:$0x1]   ;;  %s1193_s24 = smov 126   ;;  %s1194_s25 = smov 124   ;;  %v937_v12 = vld [vmem:[%s1747_s0 + $0x7f] sm:$0x1]  }
   0x4   :  { %11 = vrot.lane.b32.xlu0 %v10_v2, %s1191_s14  ;;  %39 = vrot.lane.b32.xlu1 %v38_v5, %s1192_s19  ;;  %v936_v10 = vld [vmem:[%s1747_s0 + $0x4c] sm:$0x1]   ;;  %v938_v13 = vld [vmem:[%s1747_s0 + $0x32] sm:$0x1]   ;;  %s1195_s30 = smov 123   ;;  %s1196_s2 = smov 122  }
   0x5   :  { %v51_v11 = vsel %vm13_vm3, %v936_v10, %v935_v9  ;;  %v939_v14 = vld [vmem:[%s1747_s0 + $0x65] sm:$0x1]   ;;  %v940_v15 = vld [vmem:[%s1747_s0 + $0x18] sm:$0x1]   ;;  %s1197_s7 = smov 121   ;;  %s1198_s8 = smov 120  }
   0x6   :  { %v941_v16 = vld [vmem:[%s1747_s0 + $0x4b] sm:$0x1]   ;;  %v942_v17 = vld [vmem:[%s1747_s0 + $0x7e] sm:$0x1]   ;;  %s1199_s13 = smov 119   ;;  %s1200_s14 = smov 118  }
   0x7   :  { %v943_v18 = vld [vmem:[%s1747_s0 + $0x31] sm:$0x1]   ;;  %v944_v19 = vld [vmem:[%s1747_s0 + $0x64] sm:$0x1]   ;;  %s1201_s19 = smov 117   ;;  %s1202_s20 = smov 116  }
   0x8   :  { %25 = vrot.lane.b32.xlu0 %v24_v8, %s1193_s24  ;;  %52 = vrot.lane.b32.xlu1 %v51_v11, %s1194_s25  ;;  %v945_v20 = vld [vmem:[%s1747_s0 + $0x17] sm:$0x1]   ;;  %v946_v21 = vld [vmem:[%s1747_s0 + $0x4a] sm:$0x1]   ;;  %s1203_s25 = smov 115   ;;  %s1204_s26 = smov 114  }
   0x9   :  { %v947_v22 = vld [vmem:[%s1747_s0 + $0x7d] sm:$0x1]   ;;  %v948_v23 = vld [vmem:[%s1747_s0 + $0x30] sm:$0x1]   ;;  %s1206_s3 = smov 112   ;;  %vm3_vm4 = vcmask 39936  }
   0xa   :  { %v949_v24 = vld [vmem:[%s1747_s0 + $0x63] sm:$0x1]   ;;  %v950_v25 = vld [vmem:[%s1747_s0 + $0x16] sm:$0x1]   ;;  %v2_v26 = vld [vmem:[%s1747_s0] sm:$0x1]  }
   0xb   :  { %4 = vst.msk [vmem:[#allocation0] sm:$0x1] %vm3_vm4, %v2_v26   ;;  %s1207_s10 = smov 111   ;;  %s1208_s11 = smov 110   ;;  %v951_v27 = vld [vmem:[%s1747_s0 + $0x49] sm:$0x1]  }
   0xc   :  { %62 = vrot.lane.b32.xlu0 %v937_v12, %s1195_s30  ;;  %69 = vrot.lane.b32.xlu1 %v938_v13, %s1196_s2  ;;  %s1205_s2 = smov 113   ;;  %v952_v28 = vld [vmem:[%s1747_s0 + $0x7c] sm:$0x1]   ;;  %s1209_s16 = smov 109   ;;  %v953_v29 = vld [vmem:[%s1747_s0 + $0x2f] sm:$0x1]  }
   0xd   :  { %s1210_s17 = smov 108   ;;  %v954_v30 = vld [vmem:[%s1747_s0 + $0x62] sm:$0x1]   ;;  %s1211_s22 = smov 107   ;;  %v955_v31 = vld [vmem:[%s1747_s0 + $0x15] sm:$0x1]  }
   0xe   :  { %s1212_s23 = smov 106   ;;  %v956_v32 = vld [vmem:[%s1747_s0 + $0x48] sm:$0x1]   ;;  %s1213_s28 = smov 105   ;;  %v957_v33 = vld [vmem:[%s1747_s0 + $0x7b] sm:$0x1]  }
   0xf   :  { %s1214_s29 = smov 104   ;;  %v958_v34 = vld [vmem:[%s1747_s0 + $0x2e] sm:$0x1]   ;;  %s1215_s5 = smov 103   ;;  %v959_v35 = vld [vmem:[%s1747_s0 + $0x61] sm:$0x1]  }
  0x10   :  { %76 = vrot.lane.b32.xlu0 %v939_v14, %s1197_s7  ;;  %83 = vrot.lane.b32.xlu1 %v940_v15, %s1198_s8  ;;  %s1216_s6 = smov 102   ;;  %v960_v36 = vld [vmem:[%s1747_s0 + $0x14] sm:$0x1]   ;;  %s1218_s12 = smov 100   ;;  %v961_v37 = vld [vmem:[%s1747_s0 + $0x47] sm:$0x1]  }
  0x11   :  { %v962_v38 = vld [vmem:[%s1747_s0 + $0x7a] sm:$0x1]   ;;  %s1220_s18 = smov 98   ;;  %v963_v39 = vld [vmem:[%s1747_s0 + $0x2d] sm:$0x1]   ;;  %s1222_s24 = smov 96  }
  0x12   :  { %v964_v40 = vld [vmem:[%s1747_s0 + $0x60] sm:$0x1]   ;;  %v965_v41 = vld [vmem:[%s1747_s0 + $0x13] sm:$0x1]   ;;  %v966_v42 = vld [vmem:[%s1747_s0 + $0x46] sm:$0x1]  }
  0x13   :  { %s1224_s30 = smov 94   ;;  %v967_v43 = vld [vmem:[%s1747_s0 + $0x79] sm:$0x1]   ;;  %v968_v44 = vld [vmem:[%s1747_s0 + $0x2c] sm:$0x1]   ;;  %s1226_s7 = smov 92  }
  0x14   :  { %89 = vrot.lane.b32.xlu0 %v941_v16, %s1199_s13  ;;  %96 = vrot.lane.b32.xlu1 %v942_v17, %s1200_s14  ;;  %v969_v45 = vld [vmem:[%s1747_s0 + $0x5f] sm:$0x1]   ;;  %v970_v46 = vld [vmem:[%s1747_s0 + $0x12] sm:$0x1]   ;;  %s1228_s13 = smov 90   ;;  %s1236_s8 = smov 82  }
  0x15   :  { %v971_v47 = vld [vmem:[%s1747_s0 + $0x45] sm:$0x1]   ;;  %v972_v48 = vld [vmem:[%s1747_s0 + $0x78] sm:$0x1]   ;;  %v973_v49 = vld [vmem:[%s1747_s0 + $0x2b] sm:$0x1]  }
  0x16   :  { %v974_v50 = vld [vmem:[%s1747_s0 + $0x5e] sm:$0x1]   ;;  %v975_v51 = vld [vmem:[%s1747_s0 + $0x11] sm:$0x1]   ;;  %v976_v52 = vld [vmem:[%s1747_s0 + $0x44] sm:$0x1]  }
  0x17   :  { %v977_v53 = vld [vmem:[%s1747_s0 + $0x77] sm:$0x1]   ;;  %v978_v54 = vld [vmem:[%s1747_s0 + $0x2a] sm:$0x1]   ;;  %v979_v55 = vld [vmem:[%s1747_s0 + $0x5d] sm:$0x1]  }
  0x18   :  { %103 = vrot.lane.b32.xlu0 %v943_v18, %s1201_s19  ;;  %110 = vrot.lane.b32.xlu1 %v944_v19, %s1202_s20  ;;  %s1230_s19 = smov 88   ;;  %v980_v56 = vld [vmem:[%s1747_s0 + $0x10] sm:$0x1]   ;;  %s1238_s14 = smov 80   ;;  %v981_v57 = vld [vmem:[%s1747_s0 + $0x43] sm:$0x1]  }
  0x19   :  { %v982_v58 = vld [vmem:[%s1747_s0 + $0x76] sm:$0x1]   ;;  %s1240_s20 = smov 78   ;;  %v983_v59 = vld [vmem:[%s1747_s0 + $0x29] sm:$0x1]   ;;  %s1246_s9 = smov 72  }
  0x1a   :  { %v984_v60 = vld [vmem:[%s1747_s0 + $0x5c] sm:$0x1]   ;;  %v985_v61 = vld [vmem:[%s1747_s0 + $0xf] sm:$0x1]   ;;  %v986_v62 = vld [vmem:[%s1747_s0 + $0x42] sm:$0x1]  }
  0x1b   :  { %v987_v63 = vld [vmem:[%s1747_s0 + $0x75] sm:$0x1]   ;;  %v988_v0 = vld [vmem:[%s1747_s0 + $0x28] sm:$0x1]   ;;  %v989_v1 = vld [vmem:[%s1747_s0 + $0x5b] sm:$0x1]  }
  0x1c   :  { %117 = vrot.lane.b32.xlu0 %v945_v20, %s1203_s25  ;;  %123 = vrot.lane.b32.xlu1 %v946_v21, %s1204_s26  ;;  %s1232_s25 = smov 86   ;;  %s1242_s26 = smov 76   ;;  %v990_v2 = vld [vmem:[%s1747_s0 + $0xe] sm:$0x1]   ;;  %vm16_vm5 = vcmask 1048568   ;;  %vm44_vm6 = vcmask 1048552  }
  0x1d   :  { %s1248_s15 = smov 70   ;;  %v991_v3 = vld [vmem:[%s1747_s0 + $0x41] sm:$0x1]   ;;  %v992_v5 = vld [vmem:[%s1747_s0 + $0x74] sm:$0x1]   ;;  %vm30_vm7 = vcmask 1048560  }
  0x1e   :  { %s1250_s21 = smov 68   ;;  %v993_v7 = vld [vmem:[%s1747_s0 + $0x27] sm:$0x1]   ;;  %vm57_vm8 = vcmask 1048544   ;;  %v994_v9 = vld [vmem:[%s1747_s0 + $0x5a] sm:$0x1]  }
  0x1f   :  { %vm64_vm9 = vcmask 1048536   ;;  %s1252_s27 = smov 66   ;;  %v995_v11 = vld [vmem:[%s1747_s0 + $0xd] sm:$0x1]   ;;  %vm71_vm10 = vcmask 1040336   ;;  %vm78_vm11 = vcmask 1032136  }
  0x20   :  { %130 = vrot.lane.b32.xlu0 %v947_v22, %s1205_s2  ;;  %137 = vrot.lane.b32.xlu1 %v948_v23, %s1206_s3  ;;  %s1234_s2 = smov 84   ;;  %s1244_s3 = smov 74   ;;  %v996_v13 = vld [vmem:[%s1747_s0 + $0x40] sm:$0x1]   ;;  %v997_v15 = vld [vmem:[%s1747_s0 + $0x73] sm:$0x1]  }
  0x21   :  { %s1254_s4 = smov 64   ;;  %vm85_vm12 = vcmask 1023936   ;;  %v998_v17 = vld [vmem:[%s1747_s0 + $0x26] sm:$0x1]   ;;  %vm91_vm13 = vcmask 1015736   ;;  %vm98_vm14 = vcmask 1007536  }
  0x22   :  { %v999_v19 = vld [vmem:[%s1747_s0 + $0x59] sm:$0x1]   ;;  %v1000_v21 = vld [vmem:[%s1747_s0 + $0xc] sm:$0x1]   ;;  %vm105_vm15 = vcmask 999336   ;;  %vm139_vm4 = vcmask 958336  }
  0x23   :  { %v1001_v23 = vld [vmem:[%s1747_s0 + $0x3f] sm:$0x1]  }
  0x24   :  { %144 = vrot.lane.b32.xlu0 %v949_v24, %s1207_s10  ;;  %151 = vrot.lane.b32.xlu1 %v950_v25, %s1208_s11  ;;  %s1217_s11 = smov 101   ;;  %s1256_s10 = smov 62   ;;  %v1002_v25 = vld [vmem:[%s1747_s0 + $0x72] sm:$0x1]  }
  0x28   :  { %157 = vrot.lane.b32.xlu0 %v951_v27, %s1209_s16  ;;  %164 = vrot.lane.b32.xlu1 %v952_v28, %s1210_s17  ;;  %s1219_s17 = smov 99   ;;  %s1258_s16 = smov 60   ;;  %v1003_v27 = vld [vmem:[%s1747_s0 + $0x25] sm:$0x1]  }
  0x2c   :  { %171 = vrot.lane.b32.xlu0 %v953_v29, %s1211_s22  ;;  %178 = vrot.lane.b32.xlu1 %v954_v30, %s1212_s23  ;;  %s1221_s23 = smov 97   ;;  %s1260_s22 = smov 58   ;;  %v1004_v29 = vld [vmem:[%s1747_s0 + $0x58] sm:$0x1]  }
  0x30   :  { %185 = vrot.lane.b32.xlu0 %v955_v31, %s1213_s28  ;;  %191 = vrot.lane.b32.xlu1 %v956_v32, %s1214_s29  ;;  %s1223_s29 = smov 95   ;;  %s1262_s28 = smov 56   ;;  %v1005_v31 = vld [vmem:[%s1747_s0 + $0xb] sm:$0x1]  }
  0x34   :  { %198 = vrot.lane.b32.xlu0 %v957_v33, %s1215_s5  ;;  %205 = vrot.lane.b32.xlu1 %v958_v34, %s1216_s6  ;;  %s1225_s6 = smov 93   ;;  %v1006_v33 = vld [vmem:[%s1747_s0 + $0x3e] sm:$0x1]   ;;  %s1264_s5 = smov 54  }
  0x38   :  { %212 = vrot.lane.b32.xlu0 %v959_v35, %s1217_s11  ;;  %219 = vrot.lane.b32.xlu1 %v960_v36, %s1218_s12  ;;  %s1227_s12 = smov 91   ;;  %v1007_v35 = vld [vmem:[%s1747_s0 + $0x71] sm:$0x1]   ;;  %s1266_s11 = smov 52  }
  0x3c   :  { %225 = vrot.lane.b32.xlu0 %v961_v37, %s1219_s17  ;;  %232 = vrot.lane.b32.xlu1 %v962_v38, %s1220_s18  ;;  %s1229_s18 = smov 89   ;;  %v1008_v37 = vld [vmem:[%s1747_s0 + $0x24] sm:$0x1]   ;;  %s1268_s17 = smov 50  }
  0x40   :  { %239 = vrot.lane.b32.xlu0 %v963_v39, %s1221_s23  ;;  %246 = vrot.lane.b32.xlu1 %v964_v40, %s1222_s24  ;;  %s1231_s24 = smov 87   ;;  %v1009_v39 = vld [vmem:[%s1747_s0 + $0x57] sm:$0x1]   ;;  %s1270_s23 = smov 48  }
  0x44   :  { %253 = vrot.lane.b32.xlu0 %v965_v41, %s1223_s29  ;;  %259 = vrot.lane.b32.xlu1 %v966_v42, %s1224_s30  ;;  %s1233_s30 = smov 85   ;;  %v1010_v41 = vld [vmem:[%s1747_s0 + $0xa] sm:$0x1]   ;;  %s1272_s29 = smov 46  }
  0x48   :  { %266 = vrot.lane.b32.xlu0 %v967_v43, %s1225_s6  ;;  %273 = vrot.lane.b32.xlu1 %v968_v44, %s1226_s7  ;;  %s1235_s7 = smov 83   ;;  %v1011_v43 = vld [vmem:[%s1747_s0 + $0x3d] sm:$0x1]   ;;  %s1274_s6 = smov 44  }
  0x4c   :  { %280 = vrot.lane.b32.xlu0 %v969_v45, %s1227_s12  ;;  %287 = vrot.lane.b32.xlu1 %v970_v46, %s1228_s13  ;;  %s1237_s13 = smov 81   ;;  %v1012_v45 = vld [vmem:[%s1747_s0 + $0x70] sm:$0x1]   ;;  %s1276_s12 = smov 42  }
  0x50   :  { %293 = vrot.lane.b32.xlu0 %v971_v47, %s1229_s18  ;;  %300 = vrot.lane.b32.xlu1 %v972_v48, %s1230_s19  ;;  %s1239_s19 = smov 79   ;;  %v1013_v47 = vld [vmem:[%s1747_s0 + $0x23] sm:$0x1]   ;;  %s1278_s18 = smov 40  }
  0x54   :  { %307 = vrot.lane.b32.xlu0 %v973_v49, %s1231_s24  ;;  %314 = vrot.lane.b32.xlu1 %v974_v50, %s1232_s25  ;;  %s1241_s25 = smov 77   ;;  %v1014_v49 = vld [vmem:[%s1747_s0 + $0x56] sm:$0x1]   ;;  %s1280_s24 = smov 38  }
  0x58   :  { %321 = vrot.lane.b32.xlu0 %v975_v51, %s1233_s30  ;;  %327 = vrot.lane.b32.xlu1 %v976_v52, %s1234_s2  ;;  %s1243_s2 = smov 75   ;;  %v1015_v51 = vld [vmem:[%s1747_s0 + $0x9] sm:$0x1]   ;;  %s1282_s30 = smov 36  }
  0x5c   :  { %334 = vrot.lane.b32.xlu0 %v977_v53, %s1235_s7  ;;  %341 = vrot.lane.b32.xlu1 %v978_v54, %s1236_s8  ;;  %s1245_s8 = smov 73   ;;  %v1016_v53 = vld [vmem:[%s1747_s0 + $0x3c] sm:$0x1]   ;;  %s1284_s7 = smov 34  }
  0x60   :  { %348 = vrot.lane.b32.xlu0 %v979_v55, %s1237_s13  ;;  %355 = vrot.lane.b32.xlu1 %v980_v56, %s1238_s14  ;;  %s1247_s14 = smov 71   ;;  %v1017_v55 = vld [vmem:[%s1747_s0 + $0x6f] sm:$0x1]   ;;  %s1286_s13 = smov 32  }
  0x64   :  { %361 = vrot.lane.b32.xlu0 %v981_v57, %s1239_s19  ;;  %368 = vrot.lane.b32.xlu1 %v982_v58, %s1240_s20  ;;  %s1249_s20 = smov 69   ;;  %v1018_v57 = vld [vmem:[%s1747_s0 + $0x22] sm:$0x1]   ;;  %s1288_s19 = smov 30  }
  0x68   :  { %375 = vrot.lane.b32.xlu0 %v983_v59, %s1241_s25  ;;  %382 = vrot.lane.b32.xlu1 %v984_v60, %s1242_s26  ;;  %s1251_s26 = smov 67   ;;  %v1019_v59 = vld [vmem:[%s1747_s0 + $0x55] sm:$0x1]   ;;  %s1290_s25 = smov 28  }
  0x6c   :  { %389 = vrot.lane.b32.xlu0 %v985_v61, %s1243_s2  ;;  %395 = vrot.lane.b32.xlu1 %v986_v62, %s1244_s3  ;;  %s1253_s3 = smov 65   ;;  %v1020_v61 = vld [vmem:[%s1747_s0 + $0x8] sm:$0x1]   ;;  %s1292_s2 = smov 26  }
  0x70   :  { %402 = vrot.lane.b32.xlu0 %v987_v63, %s1245_s8  ;;  %409 = vrot.lane.b32.xlu1 %v988_v0, %s1246_s9  ;;  %s1255_s9 = smov 63   ;;  %v1021_v63 = vld [vmem:[%s1747_s0 + $0x3b] sm:$0x1]   ;;  %s1294_s8 = smov 24  }
  0x74   :  { %416 = vrot.lane.b32.xlu0 %v989_v1, %s1247_s14  ;;  %423 = vrot.lane.b32.xlu1 %v990_v2, %s1248_s15  ;;  %s1257_s15 = smov 61   ;;  %v1022_v1 = vld [vmem:[%s1747_s0 + $0x6e] sm:$0x1]   ;;  %s1296_s14 = smov 22  }
  0x76   :  { %v12_v4 = vpop.permute.xlu0 %11   ;;  %v40_v6 = vpop.permute.xlu1 %39  }
  0x77   :  { %15 = vst.msk [vmem:[#allocation0 + $0x10] sm:$0x1] %vm13_vm3, %v12_v4   ;;  %vm132_vm3 = vcmask 966536  }
  0x78   :  { %18 = vst.msk [vmem:[#allocation0 + $0x8] sm:$0x1] %vm16_vm5, %v12_v4   ;;  %429 = vrot.lane.b32.xlu0 %v991_v3, %s1249_s20  ;;  %436 = vrot.lane.b32.xlu1 %v992_v5, %s1250_s21  ;;  %s1259_s21 = smov 59   ;;  %vm146_vm5 = vcmask 950136   ;;  %v1023_v3 = vld [vmem:[%s1747_s0 + $0x21] sm:$0x1]  }
  0x79   :  { %43 = vst.msk [vmem:[#allocation0 + $0x8] sm:$0x1] %vm23_vm2, %v40_v6   ;;  %vm125_vm2 = vcmask 974736   ;;  %v1024_v5 = vld [vmem:[%s1747_s0 + $0x54] sm:$0x1]   ;;  %s1298_s20 = smov 20  }
  0x7a   :  { %45 = vst.msk [vmem:[#allocation0] sm:$0x1] %vm44_vm6, %v40_v6   ;;  %v26_v8 = vpop.permute.xlu0 %25   ;;  %v53_v10 = vpop.permute.xlu1 %52   ;;  %vm153_vm6 = vcmask 941936  }
  0x7b   :  { %29 = vst.msk [vmem:[#allocation0 + $0x20] sm:$0x1] %vm27_vm1, %v26_v8   ;;  %vm119_vm1 = vcmask 982936  }
  0x7c   :  { %32 = vst.msk [vmem:[#allocation0 + $0x18] sm:$0x1] %vm30_vm7, %v26_v8   ;;  %443 = vrot.lane.b32.xlu0 %v993_v7, %s1251_s26  ;;  %450 = vrot.lane.b32.xlu1 %v994_v9, %s1252_s27  ;;  %s1261_s27 = smov 57   ;;  %vm159_vm7 = vcmask 933736   ;;  %v1025_v7 = vld [vmem:[%s1747_s0 + $0x7] sm:$0x1]  }
  0x7d   :  { %56 = vst.msk [vmem:[#allocation0 + $0x18] sm:$0x1] %vm9_vm0, %v53_v10   ;;  %vm112_vm0 = vcmask 991136   ;;  %v1026_v9 = vld [vmem:[%s1747_s0 + $0x3a] sm:$0x1]   ;;  %s1300_s26 = smov 18  }
  0x7e   :  { %59 = vst.msk [vmem:[#allocation0 + $0x10] sm:$0x1] %vm57_vm8, %v53_v10   ;;  %v63_v12 = vpop.permute.xlu0 %62   ;;  %v70_v14 = vpop.permute.xlu1 %69   ;;  %vm166_vm8 = vcmask 925536  }
  0x7f   :  { %66 = vst.msk [vmem:[#allocation0 + $0x20] sm:$0x1] %vm64_vm9, %v63_v12   ;;  %vm173_vm9 = vcmask 917336  }
  0x80   :  { %457 = vrot.lane.b32.xlu0 %v995_v11, %s1253_s3  ;;  %73 = vst.msk [vmem:[#allocation0 + $0x8] sm:$0x1] %vm71_vm10, %v70_v14   ;;  %463 = vrot.lane.b32.xlu1 %v996_v13, %s1254_s4  ;;  %s1263_s4 = smov 55   ;;  %vm180_vm10 = vcmask 909136   ;;  %v1027_v11 = vld [vmem:[%s1747_s0 + $0x6d] sm:$0x1]  }
  0x81   :  { %v1028_v13 = vld [vmem:[%s1747_s0 + $0x20] sm:$0x1]   ;;  %s1302_s3 = smov 16  }
  0x82   :  { %v77_v16 = vpop.permute.xlu0 %76   ;;  %v84_v18 = vpop.permute.xlu1 %83  }
  0x83   :  { %80 = vst.msk [vmem:[#allocation0 + $0x18] sm:$0x1] %vm78_vm11, %v77_v16   ;;  %vm187_vm11 = vcmask 900936  }
  0x84   :  { %470 = vrot.lane.b32.xlu0 %v997_v15, %s1255_s9  ;;  %86 = vst.msk [vmem:[#allocation0] sm:$0x1] %vm85_vm12, %v84_v18   ;;  %477 = vrot.lane.b32.xlu1 %v998_v17, %s1256_s10  ;;  %s1265_s10 = smov 53   ;;  %vm193_vm12 = vcmask 892736   ;;  %v1029_v15 = vld [vmem:[%s1747_s0 + $0x53] sm:$0x1]  }
  0x85   :  { %v1030_v17 = vld [vmem:[%s1747_s0 + $0x6] sm:$0x1]   ;;  %s1304_s9 = smov 14  }
  0x86   :  { %v90_v20 = vpop.permute.xlu0 %89   ;;  %v97_v22 = vpop.permute.xlu1 %96  }
  0x87   :  { %93 = vst.msk [vmem:[#allocation0 + $0x10] sm:$0x1] %vm91_vm13, %v90_v20   ;;  %vm200_vm13 = vcmask 884536  }
  0x88   :  { %484 = vrot.lane.b32.xlu0 %v999_v19, %s1257_s15  ;;  %100 = vst.msk [vmem:[#allocation0 + $0x20] sm:$0x1] %vm98_vm14, %v97_v22   ;;  %491 = vrot.lane.b32.xlu1 %v1000_v21, %s1258_s16  ;;  %s1267_s16 = smov 51   ;;  %vm207_vm14 = vcmask 876336   ;;  %v1031_v19 = vld [vmem:[%s1747_s0 + $0x39] sm:$0x1]  }
  0x89   :  { %v1032_v21 = vld [vmem:[%s1747_s0 + $0x6c] sm:$0x1]   ;;  %s1306_s15 = smov 12  }
  0x8a   :  { %v104_v24 = vpop.permute.xlu0 %103   ;;  %v111_v26 = vpop.permute.xlu1 %110  }
  0x8b   :  { %107 = vst.msk [vmem:[#allocation0 + $0x8] sm:$0x1] %vm105_vm15, %v104_v24   ;;  %vm214_vm15 = vcmask 868136  }
  0x8c   :  { %497 = vrot.lane.b32.xlu0 %v1001_v23, %s1259_s21  ;;  %114 = vst.msk [vmem:[#allocation0 + $0x18] sm:$0x1] %vm112_vm0, %v111_v26   ;;  %504 = vrot.lane.b32.xlu1 %v1002_v25, %s1260_s22  ;;  %s1269_s22 = smov 49   ;;  %vm221_vm0 = vcmask 859936   ;;  %v1033_v23 = vld [vmem:[%s1747_s0 + $0x1f] sm:$0x1]  }
  0x8d   :  { %v1034_v25 = vld [vmem:[%s1747_s0 + $0x52] sm:$0x1]   ;;  %s1308_s21 = smov 10  }
  0x8e   :  { %v118_v28 = vpop.permute.xlu0 %117   ;;  %v124_v30 = vpop.permute.xlu1 %123  }
  0x8f   :  { %120 = vst.msk [vmem:[#allocation0] sm:$0x1] %vm119_vm1, %v118_v28   ;;  %vm227_vm1 = vcmask 851736  }
  0x90   :  { %511 = vrot.lane.b32.xlu0 %v1003_v27, %s1261_s27  ;;  %127 = vst.msk [vmem:[#allocation0 + $0x10] sm:$0x1] %vm125_vm2, %v124_v30   ;;  %518 = vrot.lane.b32.xlu1 %v1004_v29, %s1262_s28  ;;  %s1271_s28 = smov 47   ;;  %vm234_vm2 = vcmask 843536   ;;  %v1035_v27 = vld [vmem:[%s1747_s0 + $0x5] sm:$0x1]  }
  0x91   :  { %v1036_v29 = vld [vmem:[%s1747_s0 + $0x38] sm:$0x1]   ;;  %s1310_s27 = smov 8  }
  0x92   :  { %v131_v32 = vpop.permute.xlu0 %130   ;;  %v138_v34 = vpop.permute.xlu1 %137  }
  0x93   :  { %134 = vst.msk [vmem:[#allocation0 + $0x20] sm:$0x1] %vm132_vm3, %v131_v32   ;;  %vm241_vm3 = vcmask 835336  }
  0x94   :  { %525 = vrot.lane.b32.xlu0 %v1005_v31, %s1263_s4  ;;  %141 = vst.msk [vmem:[#allocation0 + $0x8] sm:$0x1] %vm139_vm4, %v138_v34   ;;  %531 = vrot.lane.b32.xlu1 %v1006_v33, %s1264_s5  ;;  %s1273_s5 = smov 45   ;;  %vm248_vm4 = vcmask 827136   ;;  %v1037_v31 = vld [vmem:[%s1747_s0 + $0x6b] sm:$0x1]  }
  0x95   :  { %v1038_v33 = vld [vmem:[%s1747_s0 + $0x1e] sm:$0x1]   ;;  %s1312_s4 = smov 6  }
  0x96   :  { %v145_v36 = vpop.permute.xlu0 %144   ;;  %v152_v38 = vpop.permute.xlu1 %151  }
  0x97   :  { %148 = vst.msk [vmem:[#allocation0 + $0x18] sm:$0x1] %vm146_vm5, %v145_v36   ;;  %vm255_vm5 = vcmask 818936  }
  0x98   :  { %538 = vrot.lane.b32.xlu0 %v1007_v35, %s1265_s10  ;;  %154 = vst.msk [vmem:[#allocation0] sm:$0x1] %vm153_vm6, %v152_v38   ;;  %545 = vrot.lane.b32.xlu1 %v1008_v37, %s1266_s11  ;;  %s1275_s11 = smov 43   ;;  %vm261_vm6 = vcmask 810736   ;;  %v1039_v35 = vld [vmem:[%s1747_s0 + $0x51] sm:$0x1]  }
  0x99   :  { %v1040_v37 = vld [vmem:[%s1747_s0 + $0x4] sm:$0x1]   ;;  %s1314_s10 = smov 4  }
  0x9a   :  { %v158_v40 = vpop.permute.xlu0 %157   ;;  %v165_v42 = vpop.permute.xlu1 %164  }
  0x9b   :  { %161 = vst.msk [vmem:[#allocation0 + $0x10] sm:$0x1] %vm159_vm7, %v158_v40   ;;  %vm268_vm7 = vcmask 802536  }
  0x9c   :  { %552 = vrot.lane.b32.xlu0 %v1009_v39, %s1267_s16  ;;  %168 = vst.msk [vmem:[#allocation0 + $0x20] sm:$0x1] %vm166_vm8, %v165_v42   ;;  %559 = vrot.lane.b32.xlu1 %v1010_v41, %s1268_s17  ;;  %s1277_s17 = smov 41   ;;  %vm275_vm8 = vcmask 794336   ;;  %v1041_v39 = vld [vmem:[%s1747_s0 + $0x37] sm:$0x1]  }
  0x9d   :  { %v1042_v41 = vld [vmem:[%s1747_s0 + $0x6a] sm:$0x1]   ;;  %s1316_s16 = smov 2  }
  0x9e   :  { %v172_v44 = vpop.permute.xlu0 %171   ;;  %v179_v46 = vpop.permute.xlu1 %178  }
  0x9f   :  { %175 = vst.msk [vmem:[#allocation0 + $0x8] sm:$0x1] %vm173_vm9, %v172_v44   ;;  %vm282_vm9 = vcmask 786136  }
  0xa0   :  { %565 = vrot.lane.b32.xlu0 %v1011_v43, %s1269_s22  ;;  %182 = vst.msk [vmem:[#allocation0 + $0x18] sm:$0x1] %vm180_vm10, %v179_v46   ;;  %572 = vrot.lane.b32.xlu1 %v1012_v45, %s1270_s23  ;;  %s1279_s23 = smov 39   ;;  %vm289_vm10 = vcmask 777936   ;;  %v1043_v43 = vld [vmem:[%s1747_s0 + $0x1d] sm:$0x1]  }
  0xa1   :  { %v1044_v45 = vld [vmem:[%s1747_s0 + $0x50] sm:$0x1]  }
  0xa2   :  { %v186_v48 = vpop.permute.xlu0 %185   ;;  %v192_v50 = vpop.permute.xlu1 %191  }
  0xa3   :  { %188 = vst.msk [vmem:[#allocation0] sm:$0x1] %vm187_vm11, %v186_v48   ;;  %vm295_vm11 = vcmask 769736  }
  0xa4   :  { %579 = vrot.lane.b32.xlu0 %v1013_v47, %s1271_s28  ;;  %195 = vst.msk [vmem:[#allocation0 + $0x10] sm:$0x1] %vm193_vm12, %v192_v50   ;;  %586 = vrot.lane.b32.xlu1 %v1014_v49, %s1272_s29  ;;  %s1281_s29 = smov 37   ;;  %vm302_vm12 = vcmask 761536   ;;  %v1045_v47 = vld [vmem:[%s1747_s0 + $0x3] sm:$0x1]  }
  0xa5   :  { %v1046_v49 = vld [vmem:[%s1747_s0 + $0x36] sm:$0x1]  }
  0xa6   :  { %v199_v52 = vpop.permute.xlu0 %198   ;;  %v206_v54 = vpop.permute.xlu1 %205  }
  0xa7   :  { %202 = vst.msk [vmem:[#allocation0 + $0x20] sm:$0x1] %vm200_vm13, %v199_v52   ;;  %vm309_vm13 = vcmask 753336  }
  0xa8   :  { %593 = vrot.lane.b32.xlu0 %v1015_v51, %s1273_s5  ;;  %209 = vst.msk [vmem:[#allocation0 + $0x8] sm:$0x1] %vm207_vm14, %v206_v54   ;;  %599 = vrot.lane.b32.xlu1 %v1016_v53, %s1274_s6  ;;  %s1283_s6 = smov 35   ;;  %vm316_vm14 = vcmask 745136   ;;  %v1047_v51 = vld [vmem:[%s1747_s0 + $0x69] sm:$0x1]  }
  0xa9   :  { %v1048_v53 = vld [vmem:[%s1747_s0 + $0x1c] sm:$0x1]  }
  0xaa   :  { %v213_v56 = vpop.permute.xlu0 %212   ;;  %v220_v58 = vpop.permute.xlu1 %219  }
  0xab   :  { %216 = vst.msk [vmem:[#allocation0 + $0x18] sm:$0x1] %vm214_vm15, %v213_v56   ;;  %vm323_vm15 = vcmask 736936  }
  0xac   :  { %606 = vrot.lane.b32.xlu0 %v1017_v55, %s1275_s11  ;;  %222 = vst.msk [vmem:[#allocation0] sm:$0x1] %vm221_vm0, %v220_v58   ;;  %613 = vrot.lane.b32.xlu1 %v1018_v57, %s1276_s12  ;;  %s1285_s12 = smov 33   ;;  %vm329_vm0 = vcmask 728736   ;;  %v1049_v55 = vld [vmem:[%s1747_s0 + $0x4f] sm:$0x1]  }
  0xad   :  { %v1050_v57 = vld [vmem:[%s1747_s0 + $0x2] sm:$0x1]  }
  0xae   :  { %v226_v60 = vpop.permute.xlu0 %225   ;;  %v233_v62 = vpop.permute.xlu1 %232  }
  0xaf   :  { %229 = vst.msk [vmem:[#allocation0 + $0x10] sm:$0x1] %vm227_vm1, %v226_v60   ;;  %vm336_vm1 = vcmask 720536  }
  0xb0   :  { %620 = vrot.lane.b32.xlu0 %v1019_v59, %s1277_s17  ;;  %236 = vst.msk [vmem:[#allocation0 + $0x20] sm:$0x1] %vm234_vm2, %v233_v62   ;;  %627 = vrot.lane.b32.xlu1 %v1020_v61, %s1278_s18  ;;  %s1287_s18 = smov 31   ;;  %vm343_vm2 = vcmask 712336   ;;  %v1051_v59 = vld [vmem:[%s1747_s0 + $0x35] sm:$0x1]  }
  0xb1   :  { %v1052_v61 = vld [vmem:[%s1747_s0 + $0x68] sm:$0x1]  }
  0xb2   :  { %v240_v0 = vpop.permute.xlu0 %239   ;;  %v247_v2 = vpop.permute.xlu1 %246  }
  0xb3   :  { %243 = vst.msk [vmem:[#allocation0 + $0x8] sm:$0x1] %vm241_vm3, %v240_v0   ;;  %vm350_vm3 = vcmask 704136  }
  0xb4   :  { %633 = vrot.lane.b32.xlu0 %v1021_v63, %s1279_s23  ;;  %250 = vst.msk [vmem:[#allocation0 + $0x18] sm:$0x1] %vm248_vm4, %v247_v2   ;;  %640 = vrot.lane.b32.xlu1 %v1022_v1, %s1280_s24  ;;  %s1289_s24 = smov 29   ;;  %vm357_vm4 = vcmask 695936   ;;  %v1053_v63 = vld [vmem:[%s1747_s0 + $0x1b] sm:$0x1]  }
  0xb5   :  { %v1054_v1 = vld [vmem:[%s1747_s0 + $0x4e] sm:$0x1]  }
  0xb6   :  { %v254_v4 = vpop.permute.xlu0 %253   ;;  %v260_v6 = vpop.permute.xlu1 %259  }
  0xb7   :  { %256 = vst.msk [vmem:[#allocation0] sm:$0x1] %vm255_vm5, %v254_v4   ;;  %vm363_vm5 = vcmask 687736  }
  0xb8   :  { %647 = vrot.lane.b32.xlu0 %v1023_v3, %s1281_s29  ;;  %263 = vst.msk [vmem:[#allocation0 + $0x10] sm:$0x1] %vm261_vm6, %v260_v6   ;;  %654 = vrot.lane.b32.xlu1 %v1024_v5, %s1282_s30  ;;  %s1291_s30 = smov 27   ;;  %vm370_vm6 = vcmask 679536   ;;  %v1055_v3 = vld [vmem:[%s1747_s0 + $0x1] sm:$0x1]  }
  0xb9   :  { %v1056_v5 = vld [vmem:[%s1747_s0 + $0x34] sm:$0x1]  }
  0xba   :  { %v267_v8 = vpop.permute.xlu0 %266   ;;  %v274_v10 = vpop.permute.xlu1 %273  }
  0xbb   :  { %270 = vst.msk [vmem:[#allocation0 + $0x20] sm:$0x1] %vm268_vm7, %v267_v8   ;;  %vm377_vm7 = vcmask 671336  }
  0xbc   :  { %661 = vrot.lane.b32.xlu0 %v1025_v7, %s1283_s6  ;;  %277 = vst.msk [vmem:[#allocation0 + $0x8] sm:$0x1] %vm275_vm8, %v274_v10   ;;  %667 = vrot.lane.b32.xlu1 %v1026_v9, %s1284_s7  ;;  %s1293_s7 = smov 25   ;;  %vm384_vm8 = vcmask 663136   ;;  %v1057_v7 = vld [vmem:[%s1747_s0 + $0x67] sm:$0x1]  }
  0xbd   :  { %v1058_v9 = vld [vmem:[%s1747_s0 + $0x1a] sm:$0x1]  }
  0xbe   :  { %v281_v12 = vpop.permute.xlu0 %280   ;;  %v288_v14 = vpop.permute.xlu1 %287  }
  0xbf   :  { %284 = vst.msk [vmem:[#allocation0 + $0x18] sm:$0x1] %vm282_vm9, %v281_v12   ;;  %vm391_vm9 = vcmask 654936  }
  0xc0   :  { %674 = vrot.lane.b32.xlu0 %v1027_v11, %s1285_s12  ;;  %290 = vst.msk [vmem:[#allocation0] sm:$0x1] %vm289_vm10, %v288_v14   ;;  %681 = vrot.lane.b32.xlu1 %v1028_v13, %s1286_s13  ;;  %s1295_s13 = smov 23   ;;  %vm397_vm10 = vcmask 646736   ;;  %v1059_v11 = vld [vmem:[%s1747_s0 + $0x4d] sm:$0x1]  }
  0xc1   :  { %s1317_s0 = smov 1  }
  0xc2   :  { %v294_v16 = vpop.permute.xlu0 %293   ;;  %v301_v18 = vpop.permute.xlu1 %300  }
  0xc3   :  { %297 = vst.msk [vmem:[#allocation0 + $0x10] sm:$0x1] %vm295_vm11, %v294_v16   ;;  %vm404_vm11 = vcmask 638536  }
  0xc4   :  { %688 = vrot.lane.b32.xlu0 %v1029_v15, %s1287_s18  ;;  %304 = vst.msk [vmem:[#allocation0 + $0x20] sm:$0x1] %vm302_vm12, %v301_v18   ;;  %695 = vrot.lane.b32.xlu1 %v1030_v17, %s1288_s19  ;;  %s1297_s19 = smov 21   ;;  %vm411_vm12 = vcmask 630336  }
  0xc6   :  { %v308_v20 = vpop.permute.xlu0 %307   ;;  %v315_v22 = vpop.permute.xlu1 %314  }
  0xc7   :  { %311 = vst.msk [vmem:[#allocation0 + $0x8] sm:$0x1] %vm309_vm13, %v308_v20   ;;  %vm418_vm13 = vcmask 622136  }
  0xc8   :  { %701 = vrot.lane.b32.xlu0 %v1031_v19, %s1289_s24  ;;  %318 = vst.msk [vmem:[#allocation0 + $0x18] sm:$0x1] %vm316_vm14, %v315_v22   ;;  %708 = vrot.lane.b32.xlu1 %v1032_v21, %s1290_s25  ;;  %s1299_s25 = smov 19   ;;  %vm425_vm14 = vcmask 613936  }
  0xca   :  { %v322_v24 = vpop.permute.xlu0 %321   ;;  %v328_v26 = vpop.permute.xlu1 %327  }
  0xcb   :  { %324 = vst.msk [vmem:[#allocation0] sm:$0x1] %vm323_vm15, %v322_v24   ;;  %vm431_vm15 = vcmask 605736  }
  0xcc   :  { %715 = vrot.lane.b32.xlu0 %v1033_v23, %s1291_s30  ;;  %331 = vst.msk [vmem:[#allocation0 + $0x10] sm:$0x1] %vm329_vm0, %v328_v26   ;;  %722 = vrot.lane.b32.xlu1 %v1034_v25, %s1292_s2  ;;  %s1301_s2 = smov 17   ;;  %vm438_vm0 = vcmask 597536  }
  0xce   :  { %v335_v28 = vpop.permute.xlu0 %334   ;;  %v342_v30 = vpop.permute.xlu1 %341  }
  0xcf   :  { %338 = vst.msk [vmem:[#allocation0 + $0x20] sm:$0x1] %vm336_vm1, %v335_v28   ;;  %vm445_vm1 = vcmask 589336  }
  0xd0   :  { %729 = vrot.lane.b32.xlu0 %v1035_v27, %s1293_s7  ;;  %345 = vst.msk [vmem:[#allocation0 + $0x8] sm:$0x1] %vm343_vm2, %v342_v30   ;;  %735 = vrot.lane.b32.xlu1 %v1036_v29, %s1294_s8  ;;  %s1303_s8 = smov 15   ;;  %vm452_vm2 = vcmask 581136  }
  0xd2   :  { %v349_v32 = vpop.permute.xlu0 %348   ;;  %v356_v34 = vpop.permute.xlu1 %355  }
  0xd3   :  { %352 = vst.msk [vmem:[#allocation0 + $0x18] sm:$0x1] %vm350_vm3, %v349_v32   ;;  %vm459_vm3 = vcmask 572936  }
  0xd4   :  { %742 = vrot.lane.b32.xlu0 %v1037_v31, %s1295_s13  ;;  %358 = vst.msk [vmem:[#allocation0] sm:$0x1] %vm357_vm4, %v356_v34   ;;  %749 = vrot.lane.b32.xlu1 %v1038_v33, %s1296_s14  ;;  %s1305_s14 = smov 13   ;;  %vm465_vm4 = vcmask 564736  }
  0xd6   :  { %v362_v36 = vpop.permute.xlu0 %361   ;;  %v369_v38 = vpop.permute.xlu1 %368  }
  0xd7   :  { %365 = vst.msk [vmem:[#allocation0 + $0x10] sm:$0x1] %vm363_vm5, %v362_v36   ;;  %vm472_vm5 = vcmask 556536  }
  0xd8   :  { %756 = vrot.lane.b32.xlu0 %v1039_v35, %s1297_s19  ;;  %372 = vst.msk [vmem:[#allocation0 + $0x20] sm:$0x1] %vm370_vm6, %v369_v38   ;;  %763 = vrot.lane.b32.xlu1 %v1040_v37, %s1298_s20  ;;  %s1307_s20 = smov 11   ;;  %vm479_vm6 = vcmask 548336  }
  0xda   :  { %v376_v40 = vpop.permute.xlu0 %375   ;;  %v383_v42 = vpop.permute.xlu1 %382  }
  0xdb   :  { %379 = vst.msk [vmem:[#allocation0 + $0x8] sm:$0x1] %vm377_vm7, %v376_v40   ;;  %vm486_vm7 = vcmask 540136  }
  0xdc   :  { %769 = vrot.lane.b32.xlu0 %v1041_v39, %s1299_s25  ;;  %386 = vst.msk [vmem:[#allocation0 + $0x18] sm:$0x1] %vm384_vm8, %v383_v42   ;;  %776 = vrot.lane.b32.xlu1 %v1042_v41, %s1300_s26  ;;  %s1309_s26 = smov 9   ;;  %vm493_vm8 = vcmask 531936  }
  0xde   :  { %v390_v44 = vpop.permute.xlu0 %389   ;;  %v396_v46 = vpop.permute.xlu1 %395  }
  0xdf   :  { %392 = vst.msk [vmem:[#allocation0] sm:$0x1] %vm391_vm9, %v390_v44   ;;  %vm499_vm9 = vcmask 523736  }
  0xe0   :  { %783 = vrot.lane.b32.xlu0 %v1043_v43, %s1301_s2  ;;  %399 = vst.msk [vmem:[#allocation0 + $0x10] sm:$0x1] %vm397_vm10, %v396_v46   ;;  %790 = vrot.lane.b32.xlu1 %v1044_v45, %s1302_s3  ;;  %s1311_s3 = smov 7   ;;  %vm506_vm10 = vcmask 515536  }
  0xe2   :  { %v403_v48 = vpop.permute.xlu0 %402   ;;  %v410_v50 = vpop.permute.xlu1 %409  }
  0xe3   :  { %406 = vst.msk [vmem:[#allocation0 + $0x20] sm:$0x1] %vm404_vm11, %v403_v48   ;;  %vm513_vm11 = vcmask 507336  }
  0xe4   :  { %797 = vrot.lane.b32.xlu0 %v1045_v47, %s1303_s8  ;;  %413 = vst.msk [vmem:[#allocation0 + $0x8] sm:$0x1] %vm411_vm12, %v410_v50   ;;  %803 = vrot.lane.b32.xlu1 %v1046_v49, %s1304_s9  ;;  %s1313_s9 = smov 5   ;;  %vm520_vm12 = vcmask 499136  }
  0xe6   :  { %v417_v52 = vpop.permute.xlu0 %416   ;;  %v424_v54 = vpop.permute.xlu1 %423  }
  0xe7   :  { %420 = vst.msk [vmem:[#allocation0 + $0x18] sm:$0x1] %vm418_vm13, %v417_v52   ;;  %vm527_vm13 = vcmask 490936  }
  0xe8   :  { %810 = vrot.lane.b32.xlu0 %v1047_v51, %s1305_s14  ;;  %426 = vst.msk [vmem:[#allocation0] sm:$0x1] %vm425_vm14, %v424_v54   ;;  %817 = vrot.lane.b32.xlu1 %v1048_v53, %s1306_s15  ;;  %s1315_s15 = smov 3   ;;  %vm533_vm14 = vcmask 482736  }
  0xea   :  { %v430_v56 = vpop.permute.xlu0 %429   ;;  %v437_v58 = vpop.permute.xlu1 %436  }
  0xeb   :  { %433 = vst.msk [vmem:[#allocation0 + $0x10] sm:$0x1] %vm431_vm15, %v430_v56   ;;  %vm540_vm15 = vcmask 474536  }
  0xec   :  { %824 = vrot.lane.b32.xlu0 %v1049_v55, %s1307_s20  ;;  %440 = vst.msk [vmem:[#allocation0 + $0x20] sm:$0x1] %vm438_vm0, %v437_v58   ;;  %831 = vrot.lane.b32.xlu1 %v1050_v57, %s1308_s21  ;;  %vm547_vm0 = vcmask 466336  }
  0xee   :  { %v444_v60 = vpop.permute.xlu0 %443   ;;  %v451_v62 = vpop.permute.xlu1 %450  }
  0xef   :  { %447 = vst.msk [vmem:[#allocation0 + $0x8] sm:$0x1] %vm445_vm1, %v444_v60   ;;  %vm554_vm1 = vcmask 458136  }
  0xf0   :  { %837 = vrot.lane.b32.xlu0 %v1051_v59, %s1309_s26  ;;  %454 = vst.msk [vmem:[#allocation0 + $0x18] sm:$0x1] %vm452_vm2, %v451_v62   ;;  %844 = vrot.lane.b32.xlu1 %v1052_v61, %s1310_s27  ;;  %vm561_vm2 = vcmask 449936  }
  0xf2   :  { %v458_v0 = vpop.permute.xlu0 %457   ;;  %v464_v2 = vpop.permute.xlu1 %463  }
  0xf3   :  { %460 = vst.msk [vmem:[#allocation0] sm:$0x1] %vm459_vm3, %v458_v0   ;;  %vm567_vm3 = vcmask 441736  }
  0xf4   :  { %851 = vrot.lane.b32.xlu0 %v1053_v63, %s1311_s3  ;;  %467 = vst.msk [vmem:[#allocation0 + $0x10] sm:$0x1] %vm465_vm4, %v464_v2   ;;  %858 = vrot.lane.b32.xlu1 %v1054_v1, %s1312_s4  ;;  %vm574_vm4 = vcmask 433536  }
  0xf6   :  { %v471_v4 = vpop.permute.xlu0 %470   ;;  %v478_v6 = vpop.permute.xlu1 %477  }
  0xf7   :  { %474 = vst.msk [vmem:[#allocation0 + $0x20] sm:$0x1] %vm472_vm5, %v471_v4   ;;  %vm581_vm5 = vcmask 425336  }
  0xf8   :  { %865 = vrot.lane.b32.xlu0 %v1055_v3, %s1313_s9  ;;  %481 = vst.msk [vmem:[#allocation0 + $0x8] sm:$0x1] %vm479_vm6, %v478_v6   ;;  %871 = vrot.lane.b32.xlu1 %v1056_v5, %s1314_s10  ;;  %vm588_vm6 = vcmask 417136  }
  0xfa   :  { %v485_v8 = vpop.permute.xlu0 %484   ;;  %v492_v10 = vpop.permute.xlu1 %491  }
  0xfb   :  { %488 = vst.msk [vmem:[#allocation0 + $0x18] sm:$0x1] %vm486_vm7, %v485_v8   ;;  %vm595_vm7 = vcmask 408936  }
  0xfc   :  { %878 = vrot.lane.b32.xlu0 %v1057_v7, %s1315_s15  ;;  %494 = vst.msk [vmem:[#allocation0] sm:$0x1] %vm493_vm8, %v492_v10   ;;  %885 = vrot.lane.b32.xlu1 %v1058_v9, %s1316_s16  ;;  %vm601_vm8 = vcmask 400736  }
  0xfe   :  { %v498_v12 = vpop.permute.xlu0 %497   ;;  %v505_v13 = vpop.permute.xlu1 %504  }
  0xff   :  { %501 = vst.msk [vmem:[#allocation0 + $0x10] sm:$0x1] %vm499_vm9, %v498_v12   ;;  %vm608_vm9 = vcmask 392536  }
 0x100   :  { %892 = vrot.lane.b32.xlu0 %v1059_v11, %s1317_s0  ;;  %508 = vst.msk [vmem:[#allocation0 + $0x20] sm:$0x1] %vm506_vm10, %v505_v13   ;;  %vm615_vm10 = vcmask 384336  }
 0x102   :  { %v512_v14 = vpop.permute.xlu0 %511   ;;  %v519_v15 = vpop.permute.xlu1 %518  }
 0x103   :  { %515 = vst.msk [vmem:[#allocation0 + $0x8] sm:$0x1] %vm513_vm11, %v512_v14   ;;  %vm622_vm11 = vcmask 376136  }
 0x104   :  { %522 = vst.msk [vmem:[#allocation0 + $0x18] sm:$0x1] %vm520_vm12, %v519_v15   ;;  %vm629_vm12 = vcmask 367936  }
 0x106   :  { %v526_v16 = vpop.permute.xlu0 %525   ;;  %v532_v17 = vpop.permute.xlu1 %531  }
 0x107   :  { %528 = vst.msk [vmem:[#allocation0] sm:$0x1] %vm527_vm13, %v526_v16   ;;  %vm635_vm13 = vcmask 359736  }
 0x108   :  { %535 = vst.msk [vmem:[#allocation0 + $0x10] sm:$0x1] %vm533_vm14, %v532_v17   ;;  %vm642_vm14 = vcmask 351536  }
 0x10a   :  { %v539_v18 = vpop.permute.xlu0 %538   ;;  %v546_v19 = vpop.permute.xlu1 %545  }
 0x10b   :  { %542 = vst.msk [vmem:[#allocation0 + $0x20] sm:$0x1] %vm540_vm15, %v539_v18   ;;  %vm649_vm15 = vcmask 343336  }
 0x10c   :  { %549 = vst.msk [vmem:[#allocation0 + $0x8] sm:$0x1] %vm547_vm0, %v546_v19   ;;  %vm656_vm0 = vcmask 335136  }
 0x10e   :  { %v553_v20 = vpop.permute.xlu0 %552   ;;  %v560_v21 = vpop.permute.xlu1 %559  }
 0x10f   :  { %556 = vst.msk [vmem:[#allocation0 + $0x18] sm:$0x1] %vm554_vm1, %v553_v20   ;;  %vm663_vm1 = vcmask 326936  }
 0x110   :  { %562 = vst.msk [vmem:[#allocation0] sm:$0x1] %vm561_vm2, %v560_v21   ;;  %vm669_vm2 = vcmask 318736  }
 0x112   :  { %v566_v22 = vpop.permute.xlu0 %565   ;;  %v573_v23 = vpop.permute.xlu1 %572  }
 0x113   :  { %569 = vst.msk [vmem:[#allocation0 + $0x10] sm:$0x1] %vm567_vm3, %v566_v22   ;;  %vm676_vm3 = vcmask 310536  }
 0x114   :  { %576 = vst.msk [vmem:[#allocation0 + $0x20] sm:$0x1] %vm574_vm4, %v573_v23   ;;  %vm683_vm4 = vcmask 302336  }
 0x116   :  { %v580_v24 = vpop.permute.xlu0 %579   ;;  %v587_v25 = vpop.permute.xlu1 %586  }
 0x117   :  { %583 = vst.msk [vmem:[#allocation0 + $0x8] sm:$0x1] %vm581_vm5, %v580_v24   ;;  %vm690_vm5 = vcmask 294136  }
 0x118   :  { %590 = vst.msk [vmem:[#allocation0 + $0x18] sm:$0x1] %vm588_vm6, %v587_v25   ;;  %vm697_vm6 = vcmask 285936  }
 0x11a   :  { %v594_v26 = vpop.permute.xlu0 %593   ;;  %v600_v27 = vpop.permute.xlu1 %599  }
 0x11b   :  { %596 = vst.msk [vmem:[#allocation0] sm:$0x1] %vm595_vm7, %v594_v26   ;;  %vm703_vm7 = vcmask 277736  }
 0x11c   :  { %603 = vst.msk [vmem:[#allocation0 + $0x10] sm:$0x1] %vm601_vm8, %v600_v27   ;;  %vm710_vm8 = vcmask 269536  }
 0x11e   :  { %v607_v28 = vpop.permute.xlu0 %606   ;;  %v614_v29 = vpop.permute.xlu1 %613  }
 0x11f   :  { %610 = vst.msk [vmem:[#allocation0 + $0x20] sm:$0x1] %vm608_vm9, %v607_v28   ;;  %vm717_vm9 = vcmask 261336  }
 0x120   :  { %617 = vst.msk [vmem:[#allocation0 + $0x8] sm:$0x1] %vm615_vm10, %v614_v29   ;;  %vm724_vm10 = vcmask 253136  }
 0x122   :  { %v621_v30 = vpop.permute.xlu0 %620   ;;  %v628_v31 = vpop.permute.xlu1 %627  }
 0x123   :  { %624 = vst.msk [vmem:[#allocation0 + $0x18] sm:$0x1] %vm622_vm11, %v621_v30   ;;  %vm731_vm11 = vcmask 244936  }
 0x124   :  { %630 = vst.msk [vmem:[#allocation0] sm:$0x1] %vm629_vm12, %v628_v31   ;;  %vm737_vm12 = vcmask 236736  }
 0x126   :  { %v634_v32 = vpop.permute.xlu0 %633   ;;  %v641_v33 = vpop.permute.xlu1 %640  }
 0x127   :  { %637 = vst.msk [vmem:[#allocation0 + $0x10] sm:$0x1] %vm635_vm13, %v634_v32   ;;  %vm744_vm13 = vcmask 228536  }
 0x128   :  { %644 = vst.msk [vmem:[#allocation0 + $0x20] sm:$0x1] %vm642_vm14, %v641_v33   ;;  %vm751_vm14 = vcmask 220336  }
 0x12a   :  { %v648_v34 = vpop.permute.xlu0 %647   ;;  %v655_v35 = vpop.permute.xlu1 %654  }
 0x12b   :  { %651 = vst.msk [vmem:[#allocation0 + $0x8] sm:$0x1] %vm649_vm15, %v648_v34   ;;  %vm758_vm15 = vcmask 212136  }
 0x12c   :  { %658 = vst.msk [vmem:[#allocation0 + $0x18] sm:$0x1] %vm656_vm0, %v655_v35   ;;  %vm765_vm0 = vcmask 203936  }
 0x12e   :  { %v662_v36 = vpop.permute.xlu0 %661   ;;  %v668_v37 = vpop.permute.xlu1 %667  }
 0x12f   :  { %664 = vst.msk [vmem:[#allocation0] sm:$0x1] %vm663_vm1, %v662_v36   ;;  %vm771_vm1 = vcmask 195736  }
 0x130   :  { %671 = vst.msk [vmem:[#allocation0 + $0x10] sm:$0x1] %vm669_vm2, %v668_v37   ;;  %vm778_vm2 = vcmask 187536  }
 0x132   :  { %v675_v38 = vpop.permute.xlu0 %674   ;;  %v682_v39 = vpop.permute.xlu1 %681  }
 0x133   :  { %678 = vst.msk [vmem:[#allocation0 + $0x20] sm:$0x1] %vm676_vm3, %v675_v38   ;;  %vm785_vm3 = vcmask 179336  }
 0x134   :  { %685 = vst.msk [vmem:[#allocation0 + $0x8] sm:$0x1] %vm683_vm4, %v682_v39   ;;  %vm792_vm4 = vcmask 171136  }
 0x136   :  { %v689_v40 = vpop.permute.xlu0 %688   ;;  %v696_v41 = vpop.permute.xlu1 %695  }
 0x137   :  { %692 = vst.msk [vmem:[#allocation0 + $0x18] sm:$0x1] %vm690_vm5, %v689_v40   ;;  %vm799_vm5 = vcmask 162936  }
 0x138   :  { %698 = vst.msk [vmem:[#allocation0] sm:$0x1] %vm697_vm6, %v696_v41   ;;  %vm805_vm6 = vcmask 154736  }
 0x13a   :  { %v702_v42 = vpop.permute.xlu0 %701   ;;  %v709_v43 = vpop.permute.xlu1 %708  }
 0x13b   :  { %705 = vst.msk [vmem:[#allocation0 + $0x10] sm:$0x1] %vm703_vm7, %v702_v42   ;;  %vm812_vm7 = vcmask 146536  }
 0x13c   :  { %712 = vst.msk [vmem:[#allocation0 + $0x20] sm:$0x1] %vm710_vm8, %v709_v43   ;;  %vm819_vm8 = vcmask 138336  }
 0x13e   :  { %v716_v44 = vpop.permute.xlu0 %715   ;;  %v723_v45 = vpop.permute.xlu1 %722  }
 0x13f   :  { %719 = vst.msk [vmem:[#allocation0 + $0x8] sm:$0x1] %vm717_vm9, %v716_v44   ;;  %vm826_vm9 = vcmask 130136  }
 0x140   :  { %726 = vst.msk [vmem:[#allocation0 + $0x18] sm:$0x1] %vm724_vm10, %v723_v45   ;;  %vm833_vm10 = vcmask 121936  }
 0x142   :  { %v730_v46 = vpop.permute.xlu0 %729   ;;  %v736_v47 = vpop.permute.xlu1 %735  }
 0x143   :  { %732 = vst.msk [vmem:[#allocation0] sm:$0x1] %vm731_vm11, %v730_v46   ;;  %vm839_vm11 = vcmask 113736  }
 0x144   :  { %739 = vst.msk [vmem:[#allocation0 + $0x10] sm:$0x1] %vm737_vm12, %v736_v47   ;;  %vm846_vm12 = vcmask 105536  }
 0x146   :  { %v743_v48 = vpop.permute.xlu0 %742   ;;  %v750_v49 = vpop.permute.xlu1 %749  }
 0x147   :  { %746 = vst.msk [vmem:[#allocation0 + $0x20] sm:$0x1] %vm744_vm13, %v743_v48   ;;  %vm853_vm13 = vcmask 97336  }
 0x148   :  { %753 = vst.msk [vmem:[#allocation0 + $0x8] sm:$0x1] %vm751_vm14, %v750_v49   ;;  %vm860_vm14 = vcmask 89136  }
 0x14a   :  { %v757_v50 = vpop.permute.xlu0 %756   ;;  %v764_v51 = vpop.permute.xlu1 %763  }
 0x14b   :  { %760 = vst.msk [vmem:[#allocation0 + $0x18] sm:$0x1] %vm758_vm15, %v757_v50   ;;  %vm867_vm15 = vcmask 80936  }
 0x14c   :  { %766 = vst.msk [vmem:[#allocation0] sm:$0x1] %vm765_vm0, %v764_v51   ;;  %vm873_vm0 = vcmask 72736  }
 0x14e   :  { %v770_v52 = vpop.permute.xlu0 %769   ;;  %v777_v53 = vpop.permute.xlu1 %776  }
 0x14f   :  { %773 = vst.msk [vmem:[#allocation0 + $0x10] sm:$0x1] %vm771_vm1, %v770_v52   ;;  %vm880_vm1 = vcmask 64536  }
 0x150   :  { %780 = vst.msk [vmem:[#allocation0 + $0x20] sm:$0x1] %vm778_vm2, %v777_v53   ;;  %vm887_vm2 = vcmask 56336  }
 0x152   :  { %v784_v54 = vpop.permute.xlu0 %783   ;;  %v791_v55 = vpop.permute.xlu1 %790  }
 0x153   :  { %787 = vst.msk [vmem:[#allocation0 + $0x8] sm:$0x1] %vm785_vm3, %v784_v54   ;;  %vm894_vm3 = vcmask 48136  }
 0x154   :  { %794 = vst.msk [vmem:[#allocation0 + $0x18] sm:$0x1] %vm792_vm4, %v791_v55  }
 0x156   :  { %v798_v56 = vpop.permute.xlu0 %797   ;;  %v804_v57 = vpop.permute.xlu1 %803  }
 0x157   :  { %800 = vst.msk [vmem:[#allocation0] sm:$0x1] %vm799_vm5, %v798_v56  }
 0x158   :  { %807 = vst.msk [vmem:[#allocation0 + $0x10] sm:$0x1] %vm805_vm6, %v804_v57  }
 0x15a   :  { %v811_v58 = vpop.permute.xlu0 %810   ;;  %v818_v59 = vpop.permute.xlu1 %817  }
 0x15b   :  { %814 = vst.msk [vmem:[#allocation0 + $0x20] sm:$0x1] %vm812_vm7, %v811_v58  }
 0x15c   :  { %821 = vst.msk [vmem:[#allocation0 + $0x8] sm:$0x1] %vm819_vm8, %v818_v59  }
 0x15e   :  { %v825_v60 = vpop.permute.xlu0 %824   ;;  %v832_v61 = vpop.permute.xlu1 %831  }
 0x15f   :  { %828 = vst.msk [vmem:[#allocation0 + $0x18] sm:$0x1] %vm826_vm9, %v825_v60  }
 0x160   :  { %834 = vst.msk [vmem:[#allocation0] sm:$0x1] %vm833_vm10, %v832_v61  }
 0x162   :  { %v838_v62 = vpop.permute.xlu0 %837   ;;  %v845_v63 = vpop.permute.xlu1 %844  }
 0x163   :  { %841 = vst.msk [vmem:[#allocation0 + $0x10] sm:$0x1] %vm839_vm11, %v838_v62  }
 0x164   :  { %848 = vst.msk [vmem:[#allocation0 + $0x20] sm:$0x1] %vm846_vm12, %v845_v63  }
 0x166   :  { %v852_v0 = vpop.permute.xlu0 %851   ;;  %v859_v1 = vpop.permute.xlu1 %858  }
 0x167   :  { %855 = vst.msk [vmem:[#allocation0 + $0x8] sm:$0x1] %vm853_vm13, %v852_v0  }
 0x168   :  { %862 = vst.msk [vmem:[#allocation0 + $0x18] sm:$0x1] %vm860_vm14, %v859_v1  }
 0x16a   :  { %v866_v2 = vpop.permute.xlu0 %865   ;;  %v872_v3 = vpop.permute.xlu1 %871  }
 0x16b   :  { %868 = vst.msk [vmem:[#allocation0] sm:$0x1] %vm867_vm15, %v866_v2  }
 0x16c   :  { %875 = vst.msk [vmem:[#allocation0 + $0x10] sm:$0x1] %vm873_vm0, %v872_v3  }
 0x16e   :  { %v879_v4 = vpop.permute.xlu0 %878   ;;  %v886_v5 = vpop.permute.xlu1 %885  }
 0x16f   :  { %882 = vst.msk [vmem:[#allocation0 + $0x20] sm:$0x1] %vm880_vm1, %v879_v4  }
 0x170   :  { %889 = vst.msk [vmem:[#allocation0 + $0x8] sm:$0x1] %vm887_vm2, %v886_v5  }
 0x172   :  { %v900_v6 = vld [vmem:[#allocation0] sm:$0x1]  ;;  %v893_v7 = vpop.permute.xlu0 %892  }
 0x173   :  { %902 = vst [vmem:[%s1748_s1] sm:$0x1] %v900_v6  ;;  %v909_v8 = vld [vmem:[#allocation0 + $0x10] sm:$0x1]  ;;  %896 = vst.msk [vmem:[#allocation0 + $0x18] sm:$0x1] %vm894_vm3, %v893_v7  }
 0x174   :  { %1061 = vst [vmem:[%s1748_s1 + $0x2] sm:$0x1] %v909_v8 }
 0x176   :  { %v921_v9 = vld [vmem:[#allocation0 + $0x20] sm:$0x1] }
 0x177   :  { %1063 = vst [vmem:[%s1748_s1 + $0x4] sm:$0x1] %v921_v9  ;;  %v904_v10 = vld [vmem:[#allocation0 + $0x8] sm:$0x1] }
 0x178   :  { %1060 = vst [vmem:[%s1748_s1 + $0x1] sm:$0x1] %v904_v10 }
 0x17a   :  { %v915_v11 = vld [vmem:[#allocation0 + $0x18] sm:$0x1] }
 0x17b   :  { %1062 = vst [vmem:[%s1748_s1 + $0x3] sm:$0x1] %v915_v11 }

// kernel: _shift_points_padded.1
= control target key start
LH: loop header
LB: loop body
LE: loop exit
PB: predicated region body
PF: predicated region fallthrough
CT: control target
= control target key end

     0   :  { %v53_v0 = vlaneseq  ;;  %s479_s0 = inlined_call_operand.vmem [shape: f32[64,640], index: 0, kind: input, shape index: {}]   ;;  %s480_s1 = inlined_call_operand.vmem [shape: f32[1,640], index: 1, kind: input, shape index: {}]   ;;  %s481_s2 = inlined_call_operand.vmem [shape: f32[64,640], index: 2, kind: output, shape index: {}]  }
   0x1   :  { %v51_v1 = vld [vmem:[%s480_s1] sm:$0x1f]  ;;  %v12_v4 = vld [vmem:[%s479_s0 + $0x8] sm:$0xff]  ;;  %v13_v5 = vld [vmem:[%s479_s0 + $0x10] sm:$0xff] }
   0x2   :  { %v54_v2 = vshrl.u32 %v53_v0, 7  ;;  %v11_v3 = vld [vmem:[%s479_s0] sm:$0xff]  ;;  %v14_v6 = vld [vmem:[%s479_s0 + $0x18] sm:$0xff]  ;;  %v16_v12 = vld [vmem:[%s479_s0 + $0x28] sm:$0xff] }
   0x3   :  { %v15_v11 = vld [vmem:[%s479_s0 + $0x20] sm:$0xff]  ;;  %v17_v13 = vld [vmem:[%s479_s0 + $0x30] sm:$0xff]  ;;  %v18_v14 = vld [vmem:[%s479_s0 + $0x38] sm:$0xff] }
   0x4   :  { %v55_v7 = vsub.s32 0, %v54_v2  ;;  %v59_v8 = vsub.s32 1, %v54_v2  ;;  %v63_v9 = vsub.s32 2, %v54_v2  ;;  %v67_v10 = vsub.s32 3, %v54_v2  ;;  %v19_v16 = vld [vmem:[%s479_s0 + $0x40] sm:$0xff]  ;;  %v20_v17 = vld [vmem:[%s479_s0 + $0x48] sm:$0xff] }
   0x5   :  { %v71_v15 = vsub.s32 4, %v54_v2  ;;  %v21_v18 = vld [vmem:[%s479_s0 + $0x50] sm:$0xff]  ;;  %v22_v19 = vld [vmem:[%s479_s0 + $0x58] sm:$0xff]  ;;  %v23_v24 = vld [vmem:[%s479_s0 + $0x60] sm:$0xff] }
   0x6   :  { %v216_v20 = vrot.slane %v51_v1, %v55_v7  ;;  %v218_v21 = vrot.slane %v51_v1, %v59_v8  ;;  %v220_v22 = vrot.slane %v51_v1, %v63_v9  ;;  %v222_v23 = vrot.slane %v51_v1, %v67_v10  ;;  %v24_v25 = vld [vmem:[%s479_s0 + $0x68] sm:$0xff]  ;;  %v25_v26 = vld [vmem:[%s479_s0 + $0x70] sm:$0xff]  ;;  %v26_v27 = vld [vmem:[%s479_s0 + $0x78] sm:$0xff] }
   0x7   :  { %v236_v28 = vrot.slane %v51_v1, %v71_v15  ;;  %v27_v29 = vld [vmem:[%s479_s0 + $0x80] sm:$0xff]  ;;  %v28_v30 = vld [vmem:[%s479_s0 + $0x88] sm:$0xff]  ;;  %v29_v31 = vld [vmem:[%s479_s0 + $0x90] sm:$0xff] }
   0x8   :  { %v78_v32 = vsub.f32 %v11_v3, %v216_v20  ;;  %v79_v33 = vsub.f32 %v12_v4, %v218_v21  ;;  %v80_v34 = vsub.f32 %v13_v5, %v220_v22  ;;  %v81_v35 = vsub.f32 %v14_v6, %v222_v23  ;;  %v30_v36 = vld [vmem:[%s479_s0 + $0x98] sm:$0xff]  ;;  %v257_v37 = vld [vmem:[%s479_s0 + $0xa0] sm:$0xff]  ;;  %v262_v38 = vld [vmem:[%s479_s0 + $0xa8] sm:$0xff] }
   0x9   :  { %v82_v39 = vsub.f32 %v15_v11, %v236_v28  ;;  %v83_v40 = vsub.f32 %v16_v12, %v216_v20  ;;  %v84_v41 = vsub.f32 %v17_v13, %v218_v21  ;;  %v85_v42 = vsub.f32 %v18_v14, %v220_v22  ;;  %v33_v43 = vld [vmem:[%s479_s0 + $0xb0] sm:$0xff]  ;;  %v34_v44 = vld [vmem:[%s479_s0 + $0xb8] sm:$0xff]  ;;  %v277_v45 = vld [vmem:[%s479_s0 + $0xc0] sm:$0xff] }
   0xa   :  { %118 = vst [vmem:[%s481_s2] sm:$0xff] %v78_v32  ;;  %119 = vst [vmem:[%s481_s2 + $0x8] sm:$0xff] %v79_v33  ;;  %v86_v46 = vsub.f32 %v19_v16, %v222_v23  ;;  %v87_v47 = vsub.f32 %v20_v17, %v236_v28  ;;  %v88_v48 = vsub.f32 %v21_v18, %v216_v20  ;;  %v36_v50 = vld [vmem:[%s479_s0 + $0xc8] sm:$0xff]  ;;  %v37_v51 = vld [vmem:[%s479_s0 + $0xd0] sm:$0xff] }
   0xb   :  { %120 = vst [vmem:[%s481_s2 + $0x10] sm:$0xff] %v80_v34  ;;  %121 = vst [vmem:[%s481_s2 + $0x18] sm:$0xff] %v81_v35  ;;  %v89_v49 = vsub.f32 %v22_v19, %v218_v21  ;;  %v38_v52 = vld [vmem:[%s479_s0 + $0xd8] sm:$0xff]  ;;  %v90_v53 = vsub.f32 %v23_v24, %v220_v22  ;;  %v91_v54 = vsub.f32 %v24_v25, %v222_v23  ;;  %v39_v57 = vld [vmem:[%s479_s0 + $0xe0] sm:$0xff] }
   0xc   :  { %122 = vst [vmem:[%s481_s2 + $0x20] sm:$0xff] %v82_v39  ;;  %123 = vst [vmem:[%s481_s2 + $0x28] sm:$0xff] %v83_v40  ;;  %v92_v55 = vsub.f32 %v25_v26, %v236_v28  ;;  %v93_v56 = vsub.f32 %v26_v27, %v216_v20  ;;  %v40_v58 = vld [vmem:[%s479_s0 + $0xe8] sm:$0xff]  ;;  %v41_v59 = vld [vmem:[%s479_s0 + $0xf0] sm:$0xff]  ;;  %v94_v60 = vsub.f32 %v27_v29, %v218_v21 }
   0xd   :  { %124 = vst [vmem:[%s481_s2 + $0x30] sm:$0xff] %v84_v41  ;;  %125 = vst [vmem:[%s481_s2 + $0x38] sm:$0xff] %v85_v42  ;;  %v95_v61 = vsub.f32 %v28_v30, %v220_v22  ;;  %v96_v62 = vsub.f32 %v29_v31, %v222_v23  ;;  %v97_v63 = vsub.f32 %v30_v36, %v236_v28  ;;  %v42_v0 = vld [vmem:[%s479_s0 + $0xf8] sm:$0xff]  ;;  %v43_v1 = vld [vmem:[%s479_s0 + $0x100] sm:$0xff] }
   0xe   :  { %126 = vst [vmem:[%s481_s2 + $0x40] sm:$0xff] %v86_v46  ;;  %127 = vst [vmem:[%s481_s2 + $0x48] sm:$0xff] %v87_v47  ;;  %v44_v2 = vld [vmem:[%s479_s0 + $0x108] sm:$0xff]  ;;  %v98_v3 = vsub.f32 %v257_v37, %v216_v20  ;;  %v99_v4 = vsub.f32 %v262_v38, %v218_v21  ;;  %v100_v5 = vsub.f32 %v33_v43, %v220_v22  ;;  %v45_v7 = vld [vmem:[%s479_s0 + $0x110] sm:$0xff] }
   0xf   :  { %128 = vst [vmem:[%s481_s2 + $0x50] sm:$0xff] %v88_v48  ;;  %129 = vst [vmem:[%s481_s2 + $0x58] sm:$0xff] %v89_v49  ;;  %v101_v6 = vsub.f32 %v34_v44, %v222_v23  ;;  %v46_v8 = vld [vmem:[%s479_s0 + $0x118] sm:$0xff]  ;;  %v47_v9 = vld [vmem:[%s479_s0 + $0x120] sm:$0xff]  ;;  %v102_v10 = vsub.f32 %v277_v45, %v236_v28  ;;  %v103_v11 = vsub.f32 %v36_v50, %v216_v20 }
  0x10   :  { %130 = vst [vmem:[%s481_s2 + $0x60] sm:$0xff] %v90_v53  ;;  %131 = vst [vmem:[%s481_s2 + $0x68] sm:$0xff] %v91_v54  ;;  %v104_v12 = vsub.f32 %v37_v51, %v218_v21  ;;  %v105_v13 = vsub.f32 %v38_v52, %v220_v22  ;;  %v48_v14 = vld [vmem:[%s479_s0 + $0x128] sm:$0xff]  ;;  %v49_v15 = vld [vmem:[%s479_s0 + $0x130] sm:$0xff]  ;;  %v106_v17 = vsub.f32 %v39_v57, %v222_v23 }
  0x11   :  { %132 = vst [vmem:[%s481_s2 + $0x70] sm:$0xff] %v92_v55  ;;  %133 = vst [vmem:[%s481_s2 + $0x78] sm:$0xff] %v93_v56  ;;  %v50_v16 = vld [vmem:[%s479_s0 + $0x138] sm:$0xff]  ;;  %v107_v18 = vsub.f32 %v40_v58, %v236_v28  ;;  %v108_v19 = vsub.f32 %v41_v59, %v216_v20  ;;  %v109_v24 = vsub.f32 %v42_v0, %v218_v21 }
  0x12   :  { %134 = vst [vmem:[%s481_s2 + $0x80] sm:$0xff] %v94_v60  ;;  %135 = vst [vmem:[%s481_s2 + $0x88] sm:$0xff] %v95_v61  ;;  %v110_v25 = vsub.f32 %v43_v1, %v220_v22  ;;  %v111_v26 = vsub.f32 %v44_v2, %v222_v23  ;;  %v112_v27 = vsub.f32 %v45_v7, %v236_v28 }
  0x13   :  { %136 = vst [vmem:[%s481_s2 + $0x90] sm:$0xff] %v96_v62  ;;  %137 = vst [vmem:[%s481_s2 + $0x98] sm:$0xff] %v97_v63  ;;  %v113_v29 = vsub.f32 %v46_v8, %v216_v20  ;;  %v114_v30 = vsub.f32 %v47_v9, %v218_v21  ;;  %v115_v20 = vsub.f32 %v48_v14, %v220_v22 }
  0x14   :  { %138 = vst [vmem:[%s481_s2 + $0xa0] sm:$0xff] %v98_v3  ;;  %139 = vst [vmem:[%s481_s2 + $0xa8] sm:$0xff] %v99_v4  ;;  %v116_v31 = vsub.f32 %v49_v15, %v222_v23  ;;  %v117_v32 = vsub.f32 %v50_v16, %v236_v28 }
  0x15   :  { %140 = vst [vmem:[%s481_s2 + $0xb0] sm:$0xff] %v100_v5  ;;  %141 = vst [vmem:[%s481_s2 + $0xb8] sm:$0xff] %v101_v6 }
  0x16   :  { %142 = vst [vmem:[%s481_s2 + $0xc0] sm:$0xff] %v102_v10  ;;  %143 = vst [vmem:[%s481_s2 + $0xc8] sm:$0xff] %v103_v11 }
  0x17   :  { %144 = vst [vmem:[%s481_s2 + $0xd0] sm:$0xff] %v104_v12  ;;  %145 = vst [vmem:[%s481_s2 + $0xd8] sm:$0xff] %v105_v13 }
  0x18   :  { %146 = vst [vmem:[%s481_s2 + $0xe0] sm:$0xff] %v106_v17  ;;  %147 = vst [vmem:[%s481_s2 + $0xe8] sm:$0xff] %v107_v18 }
  0x19   :  { %148 = vst [vmem:[%s481_s2 + $0xf0] sm:$0xff] %v108_v19  ;;  %149 = vst [vmem:[%s481_s2 + $0xf8] sm:$0xff] %v109_v24 }
  0x1a   :  { %150 = vst [vmem:[%s481_s2 + $0x100] sm:$0xff] %v110_v25  ;;  %151 = vst [vmem:[%s481_s2 + $0x108] sm:$0xff] %v111_v26 }
  0x1b   :  { %152 = vst [vmem:[%s481_s2 + $0x110] sm:$0xff] %v112_v27  ;;  %153 = vst [vmem:[%s481_s2 + $0x118] sm:$0xff] %v113_v29 }
  0x1c   :  { %154 = vst [vmem:[%s481_s2 + $0x120] sm:$0xff] %v114_v30  ;;  %155 = vst [vmem:[%s481_s2 + $0x128] sm:$0xff] %v115_v20 }
  0x1d   :  { %156 = vst [vmem:[%s481_s2 + $0x130] sm:$0xff] %v116_v31  ;;  %157 = vst [vmem:[%s481_s2 + $0x138] sm:$0xff] %v117_v32 }

</bundles_post_ra>
